<compile_context>
chip_gen: v5e
topology: v5e:2x2
jax: 0.10.0
libtpu: 0.0.40
codegen_flags: <defaults>
</compile_context>

<pallas_src>
import math

import jax
import jax.numpy as jnp
import numpy as np
from jax.experimental import pallas as pl
from jax.experimental.pallas import tpu as pltpu


def _gelu_exact(x):
    # matches torch.nn.functional.gelu default (erf-based, not tanh approximation)
    return 0.5 * x * (1.0 + jax.lax.erf(x * (1.0 / math.sqrt(2.0))))


def _geglu_kernel(
    x_ref,    # (TM, D)  token tile, compute dtype (bf16)
    w1_ref,   # (D, F)   fc weight, first half  (VMEM-resident across the grid)
    b1_ref,   # (1, F)   fc bias, first half (f32)
    w2_ref,   # (D, F)   fc weight, second half
    b2_ref,   # (1, F)   fc bias, second half (f32)
    wo_ref,   # (F, D)   out weight
    bo_ref,   # (1, D)   out bias (f32)
    out_ref,  # (TM, D)  output tile in x.dtype (in-kernel cast)
):
    x = x_ref[...]                                                                   # (TM, D)
    h1 = jnp.dot(x, w1_ref[...], preferred_element_type=jnp.float32) + b1_ref[...]   # (TM, F) f32
    h2 = jnp.dot(x, w2_ref[...], preferred_element_type=jnp.float32) + b2_ref[...]   # (TM, F) f32
    g = (h1 * _gelu_exact(h2)).astype(wo_ref.dtype)                                  # (TM, F)
    y = jnp.dot(g, wo_ref[...], preferred_element_type=jnp.float32) + bo_ref[...]    # (TM, D) f32
    out_ref[...] = y.astype(out_ref.dtype)


def _round_up(n, m):
    return ((n + m - 1) // m) * m


def geglu(x, params, *, tm=512, compute_dtype=jnp.bfloat16):
    """GEGLU forward.  x: (..., D).  Returns an array of the same shape and dtype as x."""
    *lead, D = x.shape
    N = math.prod(lead) if lead else 1
    x_flat = x.reshape(N, D)

    wfc, bfc = params["wfc"], params["bfc"]        # (D, 2F), (2F,)
    wout, bout = params["wout"], params["bout"]    # (F, D), (D,)
    Fd = wfc.shape[1] // 2

    # split fc into W1 / W2: avoids a lane-axis slice of the hidden activation at a
    # non-multiple-of-128 offset inside the kernel
    w1 = wfc[:, :Fd].astype(compute_dtype)                   # (D, F)
    w2 = wfc[:, Fd:].astype(compute_dtype)                   # (D, F)
    b1 = bfc[:Fd].reshape(1, Fd).astype(jnp.float32)         # (1, F)
    b2 = bfc[Fd:].reshape(1, Fd).astype(jnp.float32)         # (1, F)
    wo = wout.astype(compute_dtype)                          # (F, D)
    bo = bout.reshape(1, D).astype(jnp.float32)              # (1, D)

    x_c = x_flat.astype(compute_dtype)

    # Token-tile selection:
    #  * clamp tm so small batches are not padded up to a huge tile (wasted MXU work),
    #  * keep it a multiple of 8 (sublane),
    #  * if that leaves a single grid step, split it in two so the "parallel" axis can be
    #    sharded across both TensorCores on v7x.
    tm_eff = min(tm, _round_up(N, 8))
    if (N + tm_eff - 1) // tm_eff == 1 and tm_eff >= 16:
        tm_eff = _round_up((N + 1) // 2, 8)
    nt = (N + tm_eff - 1) // tm_eff
    Np = nt * tm_eff
    pad = Np - N
    if pad:
        # zero rows: finite kernel outputs, cropped after the call
        x_c = jnp.pad(x_c, ((0, pad), (0, 0)))

    # VMEM budget: footprint-derived, capped per generation (v7x has 64 MiB/TC).
    cbytes = jnp.dtype(compute_dtype).itemsize
    obytes = jnp.dtype(x.dtype).itemsize
    weight_bytes = 3 * D * Fd * cbytes                       # W1, W2, Wo (resident)
    bias_bytes = (2 * Fd + D) * 4
    io_bytes = 2 * tm_eff * D * (cbytes + obytes)            # double-buffered x / out tiles
    tmp_bytes = tm_eff * Fd * (4 + 4 + cbytes)               # h1, h2 (f32), g
    vmem_needed = 2 * (weight_bytes + bias_bytes) + io_bytes + tmp_bytes
    try:
        vmem_cap = int(pltpu.get_tpu_info().vmem_capacity_bytes)
    except Exception:
        vmem_cap = 64 * 1024 * 1024                          # conservative (v7x) fallback
    vmem_limit = int(min(max(2 * vmem_needed, 32 * 1024 * 1024), int(0.85 * vmem_cap)))

    out_flat = pl.pallas_call(
        _geglu_kernel,
        out_shape=jax.ShapeDtypeStruct((Np, D), x.dtype),
        grid_spec=pltpu.PrefetchScalarGridSpec(
            num_scalar_prefetch=0,
            grid=(nt,),
            in_specs=[
                pl.BlockSpec((tm_eff, D), lambda i: (i, 0)),   # streamed token tile
                # weights / biases: constant block index -> DMA'd once, VMEM-resident
                pl.BlockSpec((D, Fd), lambda i: (0, 0)),       # W1
                pl.BlockSpec((1, Fd), lambda i: (0, 0)),       # b1
                pl.BlockSpec((D, Fd), lambda i: (0, 0)),       # W2
                pl.BlockSpec((1, Fd), lambda i: (0, 0)),       # b2
                pl.BlockSpec((Fd, D), lambda i: (0, 0)),       # Wout
                pl.BlockSpec((1, D), lambda i: (0, 0)),        # bout
            ],
            out_specs=pl.BlockSpec((tm_eff, D), lambda i: (i, 0)),
        ),
        compiler_params=pltpu.CompilerParams(
            dimension_semantics=("parallel",),
            vmem_limit_bytes=vmem_limit,
        ),
    )(x_c, w1, b1, w2, b2, wo, bo)

    return out_flat[:N].reshape(*lead, D)


def init_params(key, D, Fd):
    ks = jax.random.split(key, 4)
    s = 0.02
    return {
        "wfc":  (s * jax.random.normal(ks[0], (D, 2 * Fd))).astype(jnp.float32),
        "bfc":  (s * jax.random.normal(ks[1], (2 * Fd,))).astype(jnp.float32),
        "wout": (s * jax.random.normal(ks[2], (Fd, D))).astype(jnp.float32),
        "bout": (s * jax.random.normal(ks[3], (D,))).astype(jnp.float32),
    }


def geglu_reference(x, params, compute_dtype=jnp.float32):
    """Pure-JAX reference mirroring the PyTorch forward.

    compute_dtype=bfloat16 mirrors the kernel's bf16 matmul inputs with f32 accumulation
    for a tight comparison; float32 gives the original-module semantics.
    """
    *lead, D = x.shape
    Fd = params["wfc"].shape[1] // 2
    xf = x.reshape(-1, D).astype(compute_dtype)
    w1 = params["wfc"][:, :Fd].astype(compute_dtype)
    w2 = params["wfc"][:, Fd:].astype(compute_dtype)
    h1 = jnp.dot(xf, w1, preferred_element_type=jnp.float32) + params["bfc"][:Fd]
    h2 = jnp.dot(xf, w2, preferred_element_type=jnp.float32) + params["bfc"][Fd:]
    g = (h1 * _gelu_exact(h2)).astype(compute_dtype)
    y = jnp.dot(g, params["wout"].astype(compute_dtype),
                preferred_element_type=jnp.float32) + params["bout"]
    return y.reshape(*lead, D).astype(x.dtype)


if __name__ == "__main__":
    # config: hidden_size=32, forward_dim=64
    B, T, D, Fd = 2, 8, 32, 64

    key = jax.random.PRNGKey(0)
    kx, kp = jax.random.split(key)
    x = jax.random.normal(kx, (B, T, D), dtype=jnp.float32)
    params = init_params(kp, D, Fd)

    out = geglu(x, params)
    out = jax.block_until_ready(out)

    # tight check against a reference using the same bf16 matmul inputs / f32 accumulation
    ref_bf16 = geglu_reference(x, params, compute_dtype=jnp.bfloat16)
    np.testing.assert_allclose(np.asarray(out), np.asarray(ref_bf16), rtol=2e-3, atol=1e-4)

    # sanity check against full-f32 original-module semantics (bf16-appropriate tolerance)
    ref_f32 = geglu_reference(x, params, compute_dtype=jnp.float32)
    np.testing.assert_allclose(np.asarray(out), np.asarray(ref_f32), rtol=2e-2, atol=2e-3)

    print("KERNEL_OK")
</pallas_src>

<mosaic_0001>
module attributes {stable_mosaic.version = 11 : i64} {
  func.func @_geglu_kernel(%arg0: i32, %arg1: memref<8x32xbf16, #tpu.memory_space<vmem>>, %arg2: memref<32x64xbf16, #tpu.memory_space<vmem>>, %arg3: memref<1x64xf32, #tpu.memory_space<vmem>>, %arg4: memref<32x64xbf16, #tpu.memory_space<vmem>>, %arg5: memref<1x64xf32, #tpu.memory_space<vmem>>, %arg6: memref<64x32xbf16, #tpu.memory_space<vmem>>, %arg7: memref<1x32xf32, #tpu.memory_space<vmem>>, %arg8: memref<8x32xf32, #tpu.memory_space<vmem>>) attributes {dimension_semantics = [#tpu.dimension_semantics<parallel>], iteration_bounds = array<i64: 2>, scalar_prefetch = 0 : i64, scratch_operands = 0 : i64, tpu.core_type = #tpu.core_type<tc>, window_params = [{transform_indices = @transform_0, window_bounds = array<i64: 8, 32>}, {pipeline_mode = #tpu.pipeline_mode<synchronous>, transform_indices = @transform_1, window_bounds = array<i64: 32, 64>}, {pipeline_mode = #tpu.pipeline_mode<synchronous>, transform_indices = @transform_2, window_bounds = array<i64: 1, 64>}, {pipeline_mode = #tpu.pipeline_mode<synchronous>, transform_indices = @transform_3, window_bounds = array<i64: 32, 64>}, {pipeline_mode = #tpu.pipeline_mode<synchronous>, transform_indices = @transform_4, window_bounds = array<i64: 1, 64>}, {pipeline_mode = #tpu.pipeline_mode<synchronous>, transform_indices = @transform_5, window_bounds = array<i64: 64, 32>}, {pipeline_mode = #tpu.pipeline_mode<synchronous>, transform_indices = @transform_6, window_bounds = array<i64: 1, 32>}, {transform_indices = @transform_7, window_bounds = array<i64: 8, 32>}]} {
    %c0 = arith.constant 0 : index
    %c0_0 = arith.constant 0 : index
    %0 = vector.load %arg1[%c0, %c0_0] : memref<8x32xbf16, #tpu.memory_space<vmem>>, vector<8x32xbf16>
    %c0_1 = arith.constant 0 : index
    %c0_2 = arith.constant 0 : index
    %1 = vector.load %arg2[%c0_1, %c0_2] : memref<32x64xbf16, #tpu.memory_space<vmem>>, vector<32x64xbf16>
    %cst = arith.constant dense<0.000000e+00> : vector<8x64xf32>
    %2 = tpu.matmul %0, %1, %cst {dimension_numbers = #tpu.dot_dimension_numbers<[1], [0], [0], [1], [0, 0, 1, 1], [], []>} : vector<8x32xbf16>, vector<32x64xbf16>, vector<8x64xf32> -> vector<8x64xf32>
    %c0_3 = arith.constant 0 : index
    %c0_4 = arith.constant 0 : index
    %3 = vector.load %arg3[%c0_3, %c0_4] : memref<1x64xf32, #tpu.memory_space<vmem>>, vector<1x64xf32>
    %4 = vector.broadcast %3 : vector<1x64xf32> to vector<8x64xf32>
    %5 = arith.addf %2, %4 : vector<8x64xf32>
    %c0_5 = arith.constant 0 : index
    %c0_6 = arith.constant 0 : index
    %6 = vector.load %arg4[%c0_5, %c0_6] : memref<32x64xbf16, #tpu.memory_space<vmem>>, vector<32x64xbf16>
    %cst_7 = arith.constant dense<0.000000e+00> : vector<8x64xf32>
    %7 = tpu.matmul %0, %6, %cst_7 {dimension_numbers = #tpu.dot_dimension_numbers<[1], [0], [0], [1], [0, 0, 1, 1], [], []>} : vector<8x32xbf16>, vector<32x64xbf16>, vector<8x64xf32> -> vector<8x64xf32>
    %c0_8 = arith.constant 0 : index
    %c0_9 = arith.constant 0 : index
    %8 = vector.load %arg5[%c0_8, %c0_9] : memref<1x64xf32, #tpu.memory_space<vmem>>, vector<1x64xf32>
    %9 = vector.broadcast %8 : vector<1x64xf32> to vector<8x64xf32>
    %10 = arith.addf %7, %9 : vector<8x64xf32>
    %cst_10 = arith.constant 5.000000e-01 : f32
    %11 = vector.broadcast %cst_10 : f32 to vector<8x64xf32>
    %12 = arith.mulf %11, %10 : vector<8x64xf32>
    %cst_11 = arith.constant 0.707106769 : f32
    %13 = vector.broadcast %cst_11 : f32 to vector<8x64xf32>
    %14 = arith.mulf %10, %13 : vector<8x64xf32>
    %15 = math.erf %14 : vector<8x64xf32>
    %cst_12 = arith.constant 1.000000e+00 : f32
    %16 = vector.broadcast %cst_12 : f32 to vector<8x64xf32>
    %17 = arith.addf %16, %15 : vector<8x64xf32>
    %18 = arith.mulf %12, %17 : vector<8x64xf32>
    %19 = arith.mulf %5, %18 : vector<8x64xf32>
    %20 = arith.truncf %19 : vector<8x64xf32> to vector<8x64xbf16>
    %c0_13 = arith.constant 0 : index
    %c0_14 = arith.constant 0 : index
    %21 = vector.load %arg6[%c0_13, %c0_14] : memref<64x32xbf16, #tpu.memory_space<vmem>>, vector<64x32xbf16>
    %cst_15 = arith.constant dense<0.000000e+00> : vector<8x32xf32>
    %22 = tpu.matmul %20, %21, %cst_15 {dimension_numbers = #tpu.dot_dimension_numbers<[1], [0], [0], [1], [0, 0, 1, 1], [], []>} : vector<8x64xbf16>, vector<64x32xbf16>, vector<8x32xf32> -> vector<8x32xf32>
    %c0_16 = arith.constant 0 : index
    %c0_17 = arith.constant 0 : index
    %23 = vector.load %arg7[%c0_16, %c0_17] : memref<1x32xf32, #tpu.memory_space<vmem>>, vector<1x32xf32>
    %24 = vector.broadcast %23 : vector<1x32xf32> to vector<8x32xf32>
    %25 = arith.addf %22, %24 : vector<8x32xf32>
    %c0_18 = arith.constant 0 : index
    %c0_19 = arith.constant 0 : index
    %26 = vector.load %arg8[%c0_18, %c0_19] : memref<8x32xf32, #tpu.memory_space<vmem>>, vector<8x32xf32>
    tpu.vector_store %arg8[%c0_18, %c0_19], %25 {strides = array<i32>} : memref<8x32xf32, #tpu.memory_space<vmem>>, vector<8x32xf32>,
    return
  }
  func.func @transform_0(%arg0: i32) -> (i32, i32) {
    %c0_i32 = arith.constant 0 : i32
    %c0_i32_0 = arith.constant 0 : i32
    return %arg0, %c0_i32 : i32, i32
  }
  func.func @transform_1(%arg0: i32) -> (i32, i32) {
    %c0_i32 = arith.constant 0 : i32
    %c0_i32_0 = arith.constant 0 : i32
    %c0_i32_1 = arith.constant 0 : i32
    return %c0_i32, %c0_i32_0 : i32, i32
  }
  func.func @transform_2(%arg0: i32) -> (i32, i32) {
    %c0_i32 = arith.constant 0 : i32
    %c0_i32_0 = arith.constant 0 : i32
    %c0_i32_1 = arith.constant 0 : i32
    return %c0_i32, %c0_i32_0 : i32, i32
  }
  func.func @transform_3(%arg0: i32) -> (i32, i32) {
    %c0_i32 = arith.constant 0 : i32
    %c0_i32_0 = arith.constant 0 : i32
    %c0_i32_1 = arith.constant 0 : i32
    return %c0_i32, %c0_i32_0 : i32, i32
  }
  func.func @transform_4(%arg0: i32) -> (i32, i32) {
    %c0_i32 = arith.constant 0 : i32
    %c0_i32_0 = arith.constant 0 : i32
    %c0_i32_1 = arith.constant 0 : i32
    return %c0_i32, %c0_i32_0 : i32, i32
  }
  func.func @transform_5(%arg0: i32) -> (i32, i32) {
    %c0_i32 = arith.constant 0 : i32
    %c0_i32_0 = arith.constant 0 : i32
    %c0_i32_1 = arith.constant 0 : i32
    return %c0_i32, %c0_i32_0 : i32, i32
  }
  func.func @transform_6(%arg0: i32) -> (i32, i32) {
    %c0_i32 = arith.constant 0 : i32
    %c0_i32_0 = arith.constant 0 : i32
    %c0_i32_1 = arith.constant 0 : i32
    return %c0_i32, %c0_i32_0 : i32, i32
  }
  func.func @transform_7(%arg0: i32) -> (i32, i32) {
    %c0_i32 = arith.constant 0 : i32
    %c0_i32_0 = arith.constant 0 : i32
    return %arg0, %c0_i32 : i32, i32
  }
}

</mosaic_0001>

<bundles_post_ra>
// kernel: tpu_custom_call.1
= control target key start
LH: loop header
LB: loop body
LE: loop exit
PB: predicated region body
PF: predicated region fallthrough
CT: control target
= control target key end

     0   :  { %12 = vsyncpa [#allocation3], 0  ;;  %s844_s0 = inlined_call_operand.vmem [shape: bf16[16,32], index: 0, kind: input, shape index: {}]   ;;  %s845_s1 = inlined_call_operand.vmem [shape: bf16[32,64], index: 1, kind: input, shape index: {}]   ;;  %s846_s2 = inlined_call_operand.vmem [shape: f32[1,64], index: 2, kind: input, shape index: {}]   ;;  %s847_s3 = inlined_call_operand.vmem [shape: bf16[32,64], index: 3, kind: input, shape index: {}]   ;;  %s848_s4 = inlined_call_operand.vmem [shape: f32[1,64], index: 4, kind: input, shape index: {}]   ;;  %s849_s5 = inlined_call_operand.vmem [shape: bf16[64,32], index: 5, kind: input, shape index: {}]   ;;  %s850_s6 = inlined_call_operand.vmem [shape: f32[1,32], index: 6, kind: input, shape index: {}]   ;;  %s851_s7 = inlined_call_operand.hbm [shape: f32[16,32], index: 7, kind: output, shape index: {}]  }
   0x1   :  { %14 = vsyncpa [#allocation3 + $0x1], 0  ;;  %s723_s24 = smov 0   ;;  %s725_s25 = smov 0  }
   0x2   :  { %s727_s26 = smov 0   ;;  %s729_s27 = smov 0  }
   0x3 LB: > { %s744_s28 = sadd.s32 4294967295, %s681_s27   ;;  %s521_s29 = sadd.s32 4294967294, %s681_s27   ;;  %s681_s27 = sphi %s729_s27, %s857_s27   ;;  %s677_s26 = sphi %s727_s26, %s856_s26   ;;  %s673_s25 = sphi %s725_s25, %s855_s25   ;;  %s669_s24 = sphi %s723_s24, %s854_s24  }
   0x4   : > { %s748_s30 = sadd.s32 1, %s681_s27   ;;  %s179_s8 = sadd.s32 1, %s677_s26 }
   0x5   : > { %s176_s9 = ssub.s32 %s681_s27, %s748_s30  ;;  %p189_p0 = scmp.ne.s32.totalorder %s677_s26, %s673_s25 }
   0x6   : > { %p177_p1 = scmp.eq.s32.totalorder %s176_s9, 0  ;;  %p190_p2 = scmp.eq.s32.totalorder %s744_s28, 1 }
   0x7   : > { %p195_p3 = scmp.ne.s32.totalorder %s673_s25, %s669_s24  ;;  %p196_p4 = scmp.eq.s32.totalorder %s521_s29, 1 }
   0x8   : > { %s759_s10 = scalar_select %p177_p1, %s677_s26, %s179_s8  }
   0x9   : > { %p761_p5 = por %p190_p2, %p189_p0  ;;  %p765_p6 = por %p196_p4, %p195_p3 }
   0xa   : > { %p524_p7 = scmp.ge.s32.totalorder %s681_s27, 1  ;;  %p239_p8 = scmp.lt.s32.totalorder %s681_s27, 3 }
   0xc   : > { %p240_p9 = pnand %p524_p7, %p239_p8 }
   0xd   : > { %p270_p10 = scmp.lt.s32.totalorder (!%p240_p9), %s744_s28, 1  ;;  %s267_s29 = sand.u32 (!%p240_p9), 1, %s673_s25  }
   0xe   : > { %243 = sbr.rel (%p240_p9) target bundleno = 350 (0x15e), region = 48  ;;  %s525_s9 = sshll.u32 (!%p240_p9), %s267_s29, 3 }
   0xf   : > { %s269_s18 = scalar_lea.vmem (!%p240_p9), [#allocation2], %s525_s9  ;;  %s639_s9 = scalar_lea.hbm (!%p240_p9), %s851_s7, 16 }
  0x13   : > { %v570_v0 = vld [vmem:[%s847_s3 + $0x8] sm:$0xff]  ;;  %v569_v2 = vld [vmem:[%s847_s3] sm:$0xff]  ;;  %s271_s19 = scalar_select %p270_p10, %s744_s28, 1  ;;  %vm296_vm0 = vcmask 261120   ;;  %v574_v14 = vld [vmem:[%s849_s5 + $0x18] sm:$0xff]  ;;  %vm428_vm5 = vcmask 523264  }
  0x14   : > { %v568_v1 = vld [vmem:[%s845_s1 + $0x8] sm:$0xff]  ;;  %339 = vmatpush.bf16.msra.mxu1 %v570_v0  ;;  %v567_v3 = vld [vmem:[%s845_s1] sm:$0xff]  ;;  %436 = vmatpush.bf16.msra.mxu2 %v574_v14  ;;  %v573_v20 = vld [vmem:[%s849_s5 + $0x10] sm:$0xff] }
  0x15   : > { %306 = vmatpush.bf16.msra.mxu0 %v568_v1  ;;  %s526_s22 = sshll.u32 %s271_s19, 2  ;;  %v614_v5 = vld [vmem:[%s848_s4] ss:$0 sm:$0xff]  ;;  %v572_v24 = vld [vmem:[%s849_s5 + $0x8] sm:$0xff]  ;;  %s459_s19 = sshll.u32 %s269_s18, 4  ;;  %s460_s19 = int_to_ptr.vmem [resolvable:$true] %s459_s19 }
  0x16   : > { %s273_s8 = scalar_lea.vmem %s844_s0, %s526_s22  ;;  %v571_v29 = vld [vmem:[%s849_s5] sm:$0xff] }
  0x17   : > { %v275_v4 = vld [vmem:[%s273_s8] sm:$0xf]  ;;  %s564_s8 = sshll.u32 %s744_s28, 3  ;;  %s447_s28 = scalar_lea.sflag [#allocation3], %s267_s29 }
  0x18   : > { %340 = vmatpush.bf16.msra.mxu1 %v569_v2  ;;  %437 = vmatpush.bf16.msra.mxu2 %v573_v20  ;;  %v615_v50 = vld [vmem:[%s846_s2] ss:$0 sm:$0xff]  ;;  %s457_s15 = scalar_lea.hbm %s851_s7, %s564_s8 }
  0x19   : > { %307 = vmatpush.bf16.msra.mxu0 %v567_v3  ;;  %v616_v58 = vld [vmem:[%s850_s6] ss:$0 sm:$0xff]  ;;  %s461_s20 = sshll.u32 %s457_s15, 4  ;;  %s462_s20 = int_to_ptr.hbm [resolvable:$true] %s461_s20 }
  0x1a   : > { %s633_s21 = sshra.s32 %s462_s20, 4  ;;  %s634_s21 = int_to_ptr.hbm [resolvable:$true] %s633_s21 }
  0x1b   : > { %544 = vmatmul.msk.bf16.vlgmr.msra.gmra.mxu1 %vm296_vm0, %v275_v4  ;;  %s635_s22 = scalar_lea.hbm %s634_s21, 8  ;;  %p640_p0 = scmp.lt.s32.totalorder %s634_s21, %s851_s7 }
  0x1c   : > { %535 = vmatmul.msk.bf16.vlgmr.msra.gmra.mxu0 %vm296_vm0, %v275_v4  ;;  %438 = vmatpush.bf16.msra.mxu2 %v572_v24  ;;  %p636_p11 = scmp.ne.s32.totalorder %s634_s21, %s635_s22  ;;  %p641_p1 = scmp.lt.s32.totalorder %s639_s9, %s635_s22 }
  0x1e   : > { %p637_p12 = pnand %p636_p11, %p761_p5  ;;  %p642_p2 = por %p641_p1, %p640_p0 }
  0x20   : > { %439 = vmatpush.bf16.msra.mxu2 %v571_v29  ;;  %p638_p13 = pneg %p637_p12 }
  0x22   : > { %p643_p3 = pnand %p642_p2, %p638_p13 }
  0x98   : > { %v342_v6 = vpop.f32.mrf.mxu1 }
  0x99   : > { %v343_v7 = vadd.f32 %v614_v5, %v342_v6  ;;  %v309_v17 = vpop.f32.mrf.mxu0 }
  0x9a   : > { %v310_v53 = vadd.f32 %v615_v50, %v309_v17 }
  0x9b   : > { %v347_v8 = vmul.f32 0.70710677, %v343_v7  ;;  %v346_v52 = vmul.f32 0.5, %v343_v7 }
  0x9d   : > { %v348_v9 = vmul.f32 %v347_v8, %v347_v8 }
  0x9f   : > { %v349_v10 = vmin.f32 %v348_v9, 16.0 }
  0xa0   : > { %v344_v11 = vpop.f32.mrf.mxu1 }
  0xa1   : > { %v350_v12 = vmul.f32 2.1237322e-06, %v349_v10  ;;  %v361_v13 = vmul.f32 3.8918573e-05, %v349_v10  ;;  %v311_v27 = vpop.f32.mrf.mxu0 }
  0xa3   : > { %v351_v15 = vadd.f32 0.00028619796, %v350_v12  ;;  %v362_v16 = vadd.f32 0.001143296, %v361_v13 }
  0xa5   : > { %v352_v18 = vmul.f32 %v351_v15, %v349_v10  ;;  %v363_v19 = vmul.f32 %v362_v16, %v349_v10 }
  0xa7   : > { %v364_v21 = vadd.f32 0.014752088, %v363_v19  ;;  %v353_v22 = vadd.f32 0.0036580483, %v352_v18 }
  0xa9   : > { %v365_v23 = vmul.f32 %v364_v21, %v349_v10  ;;  %v354_v26 = vmul.f32 %v353_v22, %v349_v10 }
  0xab   : > { %v366_v25 = vadd.f32 0.112945676, %v365_v23  ;;  %v355_v31 = vadd.f32 0.05243302, %v354_v26 }
  0xad   : > { %v367_v28 = vmul.f32 %v366_v25, %v349_v10  ;;  %v356_v34 = vmul.f32 %v355_v31, %v349_v10 }
  0xaf   : > { %v368_v30 = vadd.f32 0.4994258, %v367_v28  ;;  %v357_v35 = vadd.f32 0.18741608, %v356_v34 }
  0xb1   : > { %v369_v32 = vmul.f32 %v368_v30, %v349_v10  ;;  %v358_v37 = vmul.f32 %v357_v35, %v349_v10 }
  0xb3   : > { %v370_v33 = vadd.f32 1.0, %v369_v32  ;;  %v359_v41 = vadd.f32 1.1283791, %v358_v37 }
  0xb5   : > { %617 = vrcp.f32 %v370_v33  ;;  %v382_v40 = vand.u32 2147483648, %v370_v33  ;;  %v380_v43 = vand.u32 2147483647, %v370_v33  ;;  %vm376_vm2 = vweird.f32 %v370_v33 }
  0xb6   : > { %v360_v46 = vmul.f32 %v359_v41, %v347_v8 }
  0xb7   : > { %v383_v45 = vor.u32 1.1754944e-38, %v382_v40  ;;  %vm381_vm4 = vcmp.eq.f32.partialorder %v380_v43, 8.507059e+37 }
  0xbb   : > { %v618_v36 = vpop.eup %617 }
  0xbc   : > { %v372_v38 = vmul.f32 %v618_v36, %v370_v33  ;;  %vm377_vm1 = vweird.f32 %v618_v36 }
  0xbd   : > { %vm378_vm3 = vmor %vm376_vm2, %vm377_vm1 }
  0xbe   : > { %v373_v39 = vsub.f32 1.0, %v372_v38 }
  0xc0   : > { %v374_v42 = vmul.f32 %v618_v36, %v373_v39 }
  0xc2   : > { %v375_v44 = vadd.f32 %v618_v36, %v374_v42 }
  0xc4   : > { %v379_v47 = vsel %vm378_vm3, %v618_v36, %v375_v44 }
  0xc5   : > { %v384_v48 = vsel %vm381_vm4, %v383_v45, %v379_v47 }
  0xc6   : > { %v385_v49 = vmul.f32 %v384_v48, %v360_v46 }
  0xc8   : > { %v545_v51 = vclamps-f32 %v385_v49, 1.0 }
  0xca   : > { %v388_v54 = vadd.f32 1.0, %v545_v51 }
  0xcc   : > { %v389_v55 = vmul.f32 %v388_v54, %v346_v52 }
  0xce   : > { %v390_v56 = vmul.f32 %v389_v55, %v310_v53 }
  0xd0   : > { %v391_v57 = vpack.c.bf16 %v390_v56, %v390_v56 }
  0xd2   : > { %562 = vmatmul.msk.bf16.vlgmr.msra.gmra.mxu2 %vm428_vm5, %v391_v57 }
 0x155   : > { %v441_v59 = vpop.f32.mrf.mxu2 }
 0x156   : > { %v442_v60 = vadd.f32 %v616_v58, %v441_v59 }
 0x158   : > { %445 = vst.msk [vmem:[%s269_s18] sm:$0xff] %vm296_vm0, %v442_v60 }
 0x159   : > { %646 = shalt.err (!%p643_p3)
}
 0x15a   : > { %575 = dma.vmem_to_hbm [thread:$0]  (%p761_p5), %s460_s19, 128, %s462_s20, %s447_s28  }
 0x15d   : > { %v443_v61 = vpop.f32.mrf.mxu2 }
 0x15e PF: > { %p581_p4 = scmp.ge.s32.totalorder %s681_s27, 2  ;;  %s473_s29 = sand.u32 1, %s669_s24  }
 0x15f   : > { %s474_s15 = scalar_lea.sflag [#allocation3], %s473_s29 }
 0x160   : > { %p578_p7 = pnand %p581_p4, %p765_p6 }
 0x162   : > { %p579_p8 = pneg %p578_p7 }
 0x164   : > { %664 = dma.done.wait (%p579_p8), %s474_s15, 128  }
 0x165   : > { %666 = vsyncadd (%p579_p8), %s474_s15, 4294967168  ;;  %p17_p9 = scmp.ge.s32.totalorder %s748_s30, 4   ;;  %s854_s24 = smov %s673_s25 }
 0x166   : > { %s855_s25 = smov %s677_s26  ;;  %s856_s26 = smov %s759_s10 }
 0x167   : > { %s857_s27 = smov %s748_s30  ;;  %19 = sbr.rel (!%p17_p9) target bundleno = 3 (0x3), region = 83 }
 0x16c   :  { %480 = vsyncpa [#allocation3], 1 }
 0x16d   :  { %482 = vsyncpa [#allocation3 + $0x1], 1 }

</bundles_post_ra>
